<compile_context>
chip_gen: v5e
topology: v5e:2x2
jax: 0.10.0
libtpu: 0.0.40
codegen_flags: <defaults>
</compile_context>

<pallas_src>
import functools

import numpy as np
import jax
import jax.numpy as jnp
from jax.experimental import pallas as pl
from jax.experimental.pallas import tpu as pltpu

_LANE = 128
_SUBLANE = 8


def _round_up(x, m):
    return ((x + m - 1) // m) * m


def _fused_mlp_kernel(x_ref, w_ref, b_ref, o_ref, *, num_layers):
    """Whole MLP fused: y = W_{L-1}(relu(... relu(x W_0 + b_0) ...)) + b_{L-1}.

    x_ref: (TM, D)     fp32 activation tile (feature dim zero-padded to D lanes)
    w_ref: (L, D, D)   bf16 padded weights, stored (in, out), resident across grid
    b_ref: (L, 1, D)   fp32 padded biases, resident across grid
    o_ref: (TM, D)     fp32 output tile (valid lanes exact; padded lanes are zero)
    Intermediates live only in vregs/VMEM.
    """
    h = x_ref[...].astype(jnp.bfloat16)
    for l in range(num_layers):
        y = jnp.dot(h, w_ref[l], preferred_element_type=jnp.float32)
        y = y + b_ref[l]  # (1, D) broadcast, fp32
        if l < num_layers - 1:
            y = jnp.maximum(y, 0.0)
            # TODO(synk): nn.Dropout implemented as identity (eval mode); training-mode
            # dropout would need pltpu.prng_seed/prng_random_bits + 1/(1-p) scaling.
            h = y.astype(jnp.bfloat16)
        else:
            o_ref[...] = y.astype(o_ref.dtype)


def _pick_tm(M):
    """Batch tile: cap at 512 rows; prefer >=2 grid steps (v7x megacore) if M allows."""
    TM = min(512, _round_up(M, _SUBLANE))
    if pl.cdiv(M, TM) < 2 and M >= 2 * _SUBLANE:
        TM = _round_up(pl.cdiv(M, 2), _SUBLANE)
    return TM


def make_fused_mlp(params):
    """Pack padded weights once; return a jitted forward(x) for DNN_Model (eval mode).

    params: list of (W(in,out) fp32, b(out,) fp32).
    """
    L = len(params)
    in_size = params[0][0].shape[0]
    out_size = params[-1][0].shape[1]
    dims = [in_size] + [w.shape[1] for (w, _) in params]
    D = _round_up(max(dims), _LANE)  # common padded feature width (all dims <= 128 here)

    # TODO(synk): single-D padding makes weight bytes/FLOPs quadratic in the widest
    # layer; switch to per-layer padded widths (and a layer/K pipeline so weights need
    # not all stay resident -- the ceiling is ~40-48 MiB on v7x) once any dim > 128.
    w_np = np.zeros((L, D, D), np.float32)
    b_np = np.zeros((L, 1, D), np.float32)
    for l, (w, b) in enumerate(params):
        k, n = w.shape
        w_np[l, :k, :n] = np.asarray(w, np.float32)
        b_np[l, 0, :n] = np.asarray(b, np.float32)
    w_all = jnp.asarray(w_np, jnp.bfloat16)   # bf16 MXU inputs, fp32 accumulation
    b_all = jnp.asarray(b_np, jnp.float32)

    per_layer_macs = sum(dims[i] * dims[i + 1] for i in range(L))

    @jax.jit
    def forward(x):
        M = x.shape[0]
        TM = _pick_tm(M)
        grid_m = pl.cdiv(M, TM)

        # Only the feature dim is zero-padded (128-lane, unmasked stores / MXU passes).
        # The batch dim is NOT padded: the ragged edge block's garbage rows are
        # row-contained and masked on the output store.
        x_pad = jnp.zeros((M, D), jnp.float32).at[:, :in_size].set(
            x.astype(jnp.float32))

        flops = int(2 * M * per_layer_macs)
        bytes_accessed = int(M * D * 4 + w_all.size * 2 + b_all.size * 4 + M * D * 4)

        kernel = functools.partial(_fused_mlp_kernel, num_layers=L)
        out = pl.pallas_call(
            kernel,
            out_shape=jax.ShapeDtypeStruct((M, D), jnp.float32),
            grid=(grid_m,),
            in_specs=[
                # Activations: tiled over the batch axis.
                pl.BlockSpec((TM, D), lambda i: (i, 0)),
                # Weights/biases: constant index_map -> DMA'd once, resident in VMEM.
                # (pipeline_mode=pl.Buffered(1) would drop the useless double buffer;
                #  irrelevant at D=128: resident footprint is L*D*D*2B ~ 96 KiB.)
                pl.BlockSpec((L, D, D), lambda i: (0, 0, 0)),
                pl.BlockSpec((L, 1, D), lambda i: (0, 0, 0)),
            ],
            out_specs=pl.BlockSpec((TM, D), lambda i: (i, 0)),
            compiler_params=pltpu.CompilerParams(
                dimension_semantics=("parallel",),
                vmem_limit_bytes=32 * 1024 * 1024,
            ),
            cost_estimate=pl.CostEstimate(
                flops=flops, transcendentals=0, bytes_accessed=bytes_accessed),
        )(x_pad, w_all, b_all)
        return out[:, :out_size]

    return forward


def init_dnn_params(key, input_size, hidden_sizes, output_size, num_layers):
    """Deterministic init mirroring the shapes produced by DNN_Model.__init__."""
    dims = []
    for i in range(num_layers):
        if i == 0:
            dims.append((input_size, hidden_sizes[0]))
        elif i == num_layers - 1:
            dims.append((hidden_sizes[-1], output_size))
        else:
            dims.append((hidden_sizes[i - 1], hidden_sizes[i]))

    params = []
    for (fan_in, fan_out) in dims:
        key, kw, kb = jax.random.split(key, 3)
        bound = 1.0 / jnp.sqrt(fan_in)
        # Stored as (in, out); PyTorch nn.Linear stores (out, in) - transpose of this.
        w = jax.random.uniform(kw, (fan_in, fan_out), jnp.float32, -bound, bound)
        b = jax.random.uniform(kb, (fan_out,), jnp.float32, -bound, bound)
        params.append((w, b))
    return params


def _reference_forward(x, params):
    """Pure-JAX fp32 reference of DNN_Model.forward (eval mode)."""
    L = len(params)
    for i, (w, b) in enumerate(params):
        x = x @ w + b
        if i < L - 1:
            x = jnp.maximum(x, 0.0)
    return x


if __name__ == "__main__":
    # Small shapes consistent with the module.
    batch = 8
    input_size = 32
    hidden_sizes = [64, 48]
    output_size = 16
    num_layers = 3        # 32 -> 64 -> 48 -> 16
    dropout = 0.1         # identity in eval mode

    key = jax.random.PRNGKey(0)
    key, kx = jax.random.split(key)
    x = jax.random.normal(kx, (batch, input_size), jnp.float32)
    params = init_dnn_params(key, input_size, hidden_sizes, output_size, num_layers)

    forward = make_fused_mlp(params)   # packs/pads weights once; jitted forward
    out = forward(x)
    jax.block_until_ready(out)
    assert out.shape == (batch, output_size), out.shape

    # Loose tolerance: kernel uses bf16 matmul inputs with fp32 accumulation.
    ref = _reference_forward(x, params)
    max_err = float(jnp.max(jnp.abs(out - ref)))
    assert max_err < 0.25, f"max abs error vs fp32 reference too large: {max_err}"

    print("KERNEL_OK")
</pallas_src>

<mosaic_0001>
module attributes {stable_mosaic.version = 11 : i64} {
  func.func @_fused_mlp_kernel(%arg0: i32, %arg1: memref<8x128xf32, #tpu.memory_space<vmem>>, %arg2: memref<3x128x128xbf16, #tpu.memory_space<vmem>>, %arg3: memref<3x1x128xf32, #tpu.memory_space<vmem>>, %arg4: memref<8x128xf32, #tpu.memory_space<vmem>>) attributes {dimension_semantics = [#tpu.dimension_semantics<parallel>], iteration_bounds = array<i64: 1>, scalar_prefetch = 0 : i64, scratch_operands = 0 : i64, tpu.core_type = #tpu.core_type<tc>, window_params = [{transform_indices = @transform_0, window_bounds = array<i64: 8, 128>}, {pipeline_mode = #tpu.pipeline_mode<synchronous>, transform_indices = @transform_1, window_bounds = array<i64: 3, 128, 128>}, {pipeline_mode = #tpu.pipeline_mode<synchronous>, transform_indices = @transform_2, window_bounds = array<i64: 3, 1, 128>}, {transform_indices = @transform_3, window_bounds = array<i64: 8, 128>}]} {
    %c0 = arith.constant 0 : index
    %c0_0 = arith.constant 0 : index
    %0 = vector.load %arg1[%c0, %c0_0] : memref<8x128xf32, #tpu.memory_space<vmem>>, vector<8x128xf32>
    %1 = arith.truncf %0 : vector<8x128xf32> to vector<8x128xbf16>
    %c0_1 = arith.constant 0 : index
    %c0_2 = arith.constant 0 : index
    %c0_3 = arith.constant 0 : index
    %2 = vector.load %arg2[%c0_1, %c0_2, %c0_3] : memref<3x128x128xbf16, #tpu.memory_space<vmem>>, vector<1x128x128xbf16>
    %3 = vector.shape_cast %2 : vector<1x128x128xbf16> to vector<128x128xbf16>
    %cst = arith.constant dense<0.000000e+00> : vector<8x128xf32>
    %4 = tpu.matmul %1, %3, %cst {dimension_numbers = #tpu.dot_dimension_numbers<[1], [0], [0], [1], [0, 0, 1, 1], [], []>} : vector<8x128xbf16>, vector<128x128xbf16>, vector<8x128xf32> -> vector<8x128xf32>
    %c0_4 = arith.constant 0 : index
    %c0_5 = arith.constant 0 : index
    %c0_6 = arith.constant 0 : index
    %5 = vector.load %arg3[%c0_4, %c0_5, %c0_6] : memref<3x1x128xf32, #tpu.memory_space<vmem>>, vector<1x1x128xf32>
    %6 = vector.shape_cast %5 : vector<1x1x128xf32> to vector<1x128xf32>
    %7 = vector.broadcast %6 : vector<1x128xf32> to vector<8x128xf32>
    %8 = arith.addf %4, %7 : vector<8x128xf32>
    %cst_7 = arith.constant 0.000000e+00 : f32
    %9 = vector.broadcast %cst_7 : f32 to vector<8x128xf32>
    %10 = arith.maximumf %8, %9 : vector<8x128xf32>
    %11 = arith.truncf %10 : vector<8x128xf32> to vector<8x128xbf16>
    %c1 = arith.constant 1 : index
    %c0_8 = arith.constant 0 : index
    %c0_9 = arith.constant 0 : index
    %12 = vector.load %arg2[%c1, %c0_8, %c0_9] : memref<3x128x128xbf16, #tpu.memory_space<vmem>>, vector<1x128x128xbf16>
    %13 = vector.shape_cast %12 : vector<1x128x128xbf16> to vector<128x128xbf16>
    %cst_10 = arith.constant dense<0.000000e+00> : vector<8x128xf32>
    %14 = tpu.matmul %11, %13, %cst_10 {dimension_numbers = #tpu.dot_dimension_numbers<[1], [0], [0], [1], [0, 0, 1, 1], [], []>} : vector<8x128xbf16>, vector<128x128xbf16>, vector<8x128xf32> -> vector<8x128xf32>
    %c1_11 = arith.constant 1 : index
    %c0_12 = arith.constant 0 : index
    %c0_13 = arith.constant 0 : index
    %15 = vector.load %arg3[%c1_11, %c0_12, %c0_13] : memref<3x1x128xf32, #tpu.memory_space<vmem>>, vector<1x1x128xf32>
    %16 = vector.shape_cast %15 : vector<1x1x128xf32> to vector<1x128xf32>
    %17 = vector.broadcast %16 : vector<1x128xf32> to vector<8x128xf32>
    %18 = arith.addf %14, %17 : vector<8x128xf32>
    %cst_14 = arith.constant 0.000000e+00 : f32
    %19 = vector.broadcast %cst_14 : f32 to vector<8x128xf32>
    %20 = arith.maximumf %18, %19 : vector<8x128xf32>
    %21 = arith.truncf %20 : vector<8x128xf32> to vector<8x128xbf16>
    %c2 = arith.constant 2 : index
    %c0_15 = arith.constant 0 : index
    %c0_16 = arith.constant 0 : index
    %22 = vector.load %arg2[%c2, %c0_15, %c0_16] : memref<3x128x128xbf16, #tpu.memory_space<vmem>>, vector<1x128x128xbf16>
    %23 = vector.shape_cast %22 : vector<1x128x128xbf16> to vector<128x128xbf16>
    %cst_17 = arith.constant dense<0.000000e+00> : vector<8x128xf32>
    %24 = tpu.matmul %21, %23, %cst_17 {dimension_numbers = #tpu.dot_dimension_numbers<[1], [0], [0], [1], [0, 0, 1, 1], [], []>} : vector<8x128xbf16>, vector<128x128xbf16>, vector<8x128xf32> -> vector<8x128xf32>
    %c2_18 = arith.constant 2 : index
    %c0_19 = arith.constant 0 : index
    %c0_20 = arith.constant 0 : index
    %25 = vector.load %arg3[%c2_18, %c0_19, %c0_20] : memref<3x1x128xf32, #tpu.memory_space<vmem>>, vector<1x1x128xf32>
    %26 = vector.shape_cast %25 : vector<1x1x128xf32> to vector<1x128xf32>
    %27 = vector.broadcast %26 : vector<1x128xf32> to vector<8x128xf32>
    %28 = arith.addf %24, %27 : vector<8x128xf32>
    %c0_21 = arith.constant 0 : index
    %c0_22 = arith.constant 0 : index
    %29 = vector.load %arg4[%c0_21, %c0_22] : memref<8x128xf32, #tpu.memory_space<vmem>>, vector<8x128xf32>
    tpu.vector_store %arg4[%c0_21, %c0_22], %28 {strides = array<i32>} : memref<8x128xf32, #tpu.memory_space<vmem>>, vector<8x128xf32>,
    return
  }
  func.func @transform_0(%arg0: i32) -> (i32, i32) {
    %c0_i32 = arith.constant 0 : i32
    %c0_i32_0 = arith.constant 0 : i32
    return %arg0, %c0_i32 : i32, i32
  }
  func.func @transform_1(%arg0: i32) -> (i32, i32, i32) {
    %c0_i32 = arith.constant 0 : i32
    %c0_i32_0 = arith.constant 0 : i32
    %c0_i32_1 = arith.constant 0 : i32
    %c0_i32_2 = arith.constant 0 : i32
    return %c0_i32, %c0_i32_0, %c0_i32_1 : i32, i32, i32
  }
  func.func @transform_2(%arg0: i32) -> (i32, i32, i32) {
    %c0_i32 = arith.constant 0 : i32
    %c0_i32_0 = arith.constant 0 : i32
    %c0_i32_1 = arith.constant 0 : i32
    %c0_i32_2 = arith.constant 0 : i32
    return %c0_i32, %c0_i32_0, %c0_i32_1 : i32, i32, i32
  }
  func.func @transform_3(%arg0: i32) -> (i32, i32) {
    %c0_i32 = arith.constant 0 : i32
    %c0_i32_0 = arith.constant 0 : i32
    return %arg0, %c0_i32 : i32, i32
  }
}

</mosaic_0001>

<bundles_post_ra>
// kernel: forward.1
= control target key start
LH: loop header
LB: loop body
LE: loop exit
PB: predicated region body
PF: predicated region fallthrough
CT: control target
= control target key end

     0   :  { %8 = vsyncpa [#allocation3], 0  ;;  %s525_s0 = inlined_call_operand.vmem [shape: f32[8,128], index: 0, kind: input, shape index: {}]   ;;  %s526_s1 = inlined_call_operand.hbm [shape: bf16[3,128,128], index: 1, kind: input, shape index: {}]   ;;  %s527_s2 = inlined_call_operand.vmem [shape: f32[3,1,128], index: 2, kind: input, shape index: {}]   ;;  %s528_s3 = inlined_call_operand.hbm [shape: f32[8,128], index: 3, kind: output, shape index: {}]  }
   0x1   :  { %9 = vsyncpa [#allocation4], 0  ;;  %s16_s14 = sshll.u32 %s526_s1, 4  ;;  %s483_s15 = smov [#allocation2]   ;;  %s17_s14 = int_to_ptr.hbm [resolvable:$true] %s16_s14 }
   0x2   :  { %s18_s16 = sshll.u32 %s483_s15, 4  ;;  %s484_s17 = smov 64   ;;  %s19_s16 = int_to_ptr.vmem [resolvable:$true] %s18_s16 }
   0x3   :  { %s485_s18 = smov 4  }
   0x4   :  { %24 = dma.hbm_to_vmem [thread:$0]  %s17_s14, 3072, %s19_s16, [#allocation3], %s484_s17, %s484_s17, %s485_s18  }
   0x5   :  { %479 = dma.done.wait [#allocation3], 3072  }
   0x6   :  { %480 = vsyncadd [#allocation3], 4294964224  ;;  %v407_v0 = vld [vmem:[#allocation2 + $0x38] sm:$0xff]  ;;  %v406_v1 = vld [vmem:[#allocation2 + $0x30] sm:$0xff]  ;;  %s486_s25 = smov [#allocation5]   ;;  %s292_s29 = sshll.u32 %s528_s3, 4  ;;  %s293_s29 = int_to_ptr.hbm [resolvable:$true] %s292_s29 }
   0x7   :  { %101 = vmatpush.bf16.msra.mxu0 %v407_v0  ;;  %v415_v2 = vld [vmem:[#allocation2 + $0x78] sm:$0xff]  ;;  %v414_v3 = vld [vmem:[#allocation2 + $0x70] sm:$0xff]  ;;  %v405_v4 = vld [vmem:[#allocation2 + $0x28] sm:$0xff]  ;;  %s290_s26 = sshll.u32 %s486_s25, 4  ;;  %s291_s26 = int_to_ptr.vmem [resolvable:$true] %s290_s26 }
   0x8   :  { %186 = vmatpush.bf16.msra.mxu1 %v415_v2  ;;  %v413_v5 = vld [vmem:[#allocation2 + $0x68] sm:$0xff]  ;;  %v404_v6 = vld [vmem:[#allocation2 + $0x20] sm:$0xff]  ;;  %v403_v8 = vld [vmem:[#allocation2 + $0x18] sm:$0xff] }
   0x9   :  { %v412_v7 = vld [vmem:[#allocation2 + $0x60] sm:$0xff]  ;;  %v411_v9 = vld [vmem:[#allocation2 + $0x58] sm:$0xff]  ;;  %v402_v10 = vld [vmem:[#allocation2 + $0x10] sm:$0xff] }
   0xa   :  { %v410_v11 = vld [vmem:[#allocation2 + $0x50] sm:$0xff]  ;;  %v401_v12 = vld [vmem:[#allocation2 + $0x8] sm:$0xff]  ;;  %v400_v13 = vld [vmem:[#allocation2] sm:$0xff] }
   0xb   :  { %102 = vmatpush.bf16.msra.mxu0 %v406_v1  ;;  %v31_v14 = vld [vmem:[%s525_s0] sm:$0xff]  ;;  %v409_v16 = vld [vmem:[#allocation2 + $0x48] sm:$0xff]  ;;  %v423_v18 = vld [vmem:[#allocation2 + $0xb8] sm:$0xff] }
   0xc   :  { %187 = vmatpush.bf16.msra.mxu1 %v414_v3  ;;  %v32_v15 = vpack.c.bf16 %v31_v14, %v31_v14  ;;  %v408_v17 = vld [vmem:[#allocation2 + $0x40] sm:$0xff]  ;;  %271 = vmatpush.bf16.msra.mxu2 %v423_v18  ;;  %v422_v19 = vld [vmem:[#allocation2 + $0xb0] sm:$0xff]  ;;  %v421_v20 = vld [vmem:[#allocation2 + $0xa8] sm:$0xff] }
   0xd   :  { %v420_v21 = vld [vmem:[#allocation2 + $0xa0] sm:$0xff]  ;;  %v419_v22 = vld [vmem:[#allocation2 + $0x98] sm:$0xff]  ;;  %v418_v23 = vld [vmem:[#allocation2 + $0x90] sm:$0xff] }
   0xe   :  { %v428_v24 = vld [vmem:[%s527_s2] ss:$0 sm:$0xff]  ;;  %v417_v30 = vld [vmem:[#allocation2 + $0x88] sm:$0xff]  ;;  %v429_v32 = vld [vmem:[%s527_s2 + $0x1] ss:$0 sm:$0xff] }
   0xf   :  { %103 = vmatpush.bf16.msra.mxu0 %v405_v4  ;;  %v416_v31 = vld [vmem:[#allocation2 + $0x80] sm:$0xff] }
  0x10   :  { %188 = vmatpush.bf16.msra.mxu1 %v413_v5  ;;  %272 = vmatpush.bf16.msra.mxu2 %v422_v19  ;;  %v430_v38 = vld [vmem:[%s527_s2 + $0x2] ss:$0 sm:$0xff] }
  0x13   :  { %104 = vmatpush.bf16.msra.mxu0 %v404_v6 }
  0x14   :  { %189 = vmatpush.bf16.msra.mxu1 %v412_v7  ;;  %273 = vmatpush.bf16.msra.mxu2 %v421_v20 }
  0x17   :  { %105 = vmatpush.bf16.msra.mxu0 %v403_v8 }
  0x18   :  { %190 = vmatpush.bf16.msra.mxu1 %v411_v9  ;;  %274 = vmatpush.bf16.msra.mxu2 %v420_v21 }
  0x1b   :  { %106 = vmatpush.bf16.msra.mxu0 %v402_v10 }
  0x1c   :  { %191 = vmatpush.bf16.msra.mxu1 %v410_v11  ;;  %275 = vmatpush.bf16.msra.mxu2 %v419_v22 }
  0x1f   :  { %107 = vmatpush.bf16.msra.mxu0 %v401_v12 }
  0x20   :  { %192 = vmatpush.bf16.msra.mxu1 %v409_v16  ;;  %276 = vmatpush.bf16.msra.mxu2 %v418_v23 }
  0x23   :  { %108 = vmatpush.bf16.msra.mxu0 %v400_v13 }
  0x24   :  { %193 = vmatpush.bf16.msra.mxu1 %v408_v17  ;;  %277 = vmatpush.bf16.msra.mxu2 %v417_v30 }
  0x26   :  { %109 = vmatmul.bf16.vlgmr.msra.gmra.mxu0 %v32_v15 }
  0x28   :  { %278 = vmatpush.bf16.msra.mxu2 %v416_v31 }
  0xa3   :  { %v110_v25 = vpop.f32.mrf.mxu0 }
  0xa4   :  { %v111_v26 = vadd.f32 %v428_v24, %v110_v25 }
  0xa6   :  { %v114_v27 = vmax.f32 %v111_v26, 0.0 }
  0xa8   :  { %v115_v28 = vpack.c.bf16 %v114_v27, %v114_v27 }
  0xaa   :  { %194 = vmatmul.bf16.vlgmr.msra.gmra.mxu1 %v115_v28 }
  0xab   :  { %v112_v29 = vpop.f32.mrf.mxu0 }
 0x127   :  { %v195_v33 = vpop.f32.mrf.mxu1 }
 0x128   :  { %v196_v34 = vadd.f32 %v429_v32, %v195_v33 }
 0x12a   :  { %v199_v35 = vmax.f32 %v196_v34, 0.0 }
 0x12c   :  { %v200_v36 = vpack.c.bf16 %v199_v35, %v199_v35 }
 0x12e   :  { %279 = vmatmul.bf16.vlgmr.msra.gmra.mxu2 %v200_v36 }
 0x12f   :  { %v197_v37 = vpop.f32.mrf.mxu1 }
 0x1b1   :  { %v280_v39 = vpop.f32.mrf.mxu2 }
 0x1b2   :  { %v281_v40 = vadd.f32 %v430_v38, %v280_v39 }
 0x1b4   :  { %284 = vst [vmem:[#allocation5] sm:$0xff] %v281_v40 }
 0x1b5   :  { %295 = dma.vmem_to_hbm [thread:$0]  %s291_s26, 128, %s293_s29, [#allocation4]  }
 0x1b9   :  { %v282_v41 = vpop.f32.mrf.mxu2 }
 0x1ba   :  { %481 = dma.done.wait [#allocation4], 128  }
 0x1bb   :  { %482 = vsyncadd [#allocation4], 4294967168 }
 0x1bc   :  { %300 = vsyncpa [#allocation3], 1 }
 0x1bd   :  { %301 = vsyncpa [#allocation4], 1 }

</bundles_post_ra>
